<compile_context>
chip_gen: v5e
topology: v5e:2x2
jax: 0.10.0
libtpu: 0.0.40
codegen_flags: <defaults>
</compile_context>

<pallas_src>
import jax
import jax.numpy as jnp
from jax.experimental import pallas as pl
from jax.experimental.pallas import tpu as pltpu


def _round_up(n, m):
    return ((n + m - 1) // m) * m


# ----------------------------- Pallas kernel --------------------------------

def _mlp_kernel(x_ref,
                w1_ref, t1_ref,
                w2_ref, t2_ref,
                w3_ref, t3_ref,
                o_ref):
    # compute dtype for the layer-2/3 MXU inputs (bf16 in production, f32 exact)
    cdt = w2_ref.dtype

    # layer 1: Linear(12,128) with folded bias+BN, ReLU.  Kept in f32 (K=12 is
    # <5% of the FLOPs, so exactness here is free).  (Dropout p=0.6: identity.)
    h = jnp.dot(x_ref[...], w1_ref[...], preferred_element_type=jnp.float32)
    h = jnp.maximum(h + t1_ref[...], 0.0)

    # layer 2: Linear(128,128) with folded bias+BN, ReLU.  (Dropout p=0.7: id.)
    h = jnp.dot(h.astype(cdt), w2_ref[...], preferred_element_type=jnp.float32)
    h = jnp.maximum(h + t2_ref[...], 0.0)

    # layer 3: Linear(128,64) with folded bias+BN, ReLU -> stored directly as
    # the real 64 output features (no lane padding, no wrapper slice).
    h = jnp.dot(h.astype(cdt), w3_ref[...], preferred_element_type=jnp.float32)
    o_ref[...] = jnp.maximum(h + t3_ref[...], 0.0).astype(o_ref.dtype)


# ------------------------------- wrapper -------------------------------------

def _effective_tile(B, tm):
    """Batch-tile size.

    Small B: one block covering the whole batch (rounded to a sublane-friendly
    multiple).  Large B: big tiles (default 2048) to amortize per-step
    overhead, but at least ~4 grid steps so v7x can shard the parallel axis
    across both TensorCores.
    """
    if B <= 1024:
        return _round_up(max(B, 16), 16)
    quarter = _round_up(-(-B // 4), 512)       # ceil(B/4) rounded to 512
    return int(min(tm, max(512, quarter)))


def feat_l_kirp_forward(x, folded_params, *, tm=2048):
    """x: (B, 12) float32. Returns (B, 64) float32."""
    B, F_in = x.shape
    assert F_in == 12

    # w2/w3 already in the desired compute dtype (pre-cast once in fold_params);
    # w1 and all shifts are f32.
    w1, t1, w2, t2, w3, t3 = folded_params

    tm_eff = _effective_tile(B, tm)
    grid = (pl.cdiv(B, tm_eff),)               # partial last block handled by Pallas

    def wspec(arr):
        # full-array block, same block for every batch tile (broadcast weight)
        return pl.BlockSpec(arr.shape, lambda i: (0, 0))

    out = pl.pallas_call(
        _mlp_kernel,
        out_shape=jax.ShapeDtypeStruct((B, 64), jnp.float32),
        grid_spec=pltpu.PrefetchScalarGridSpec(
            num_scalar_prefetch=0,
            grid=grid,
            in_specs=[
                pl.BlockSpec((tm_eff, 12), lambda i: (i, 0)),   # x tile (f32)
                wspec(w1), wspec(t1),
                wspec(w2), wspec(t2),
                wspec(w3), wspec(t3),
            ],
            out_specs=pl.BlockSpec((tm_eff, 64), lambda i: (i, 0)),
        ),
        compiler_params=pltpu.CompilerParams(
            dimension_semantics=("parallel",)),
    )(x, w1, t1, w2, t2, w3, t3)

    return out


# --------------------------- parameter construction -------------------------

def _xavier_uniform(key, fan_in, fan_out):
    bound = (6.0 / (fan_in + fan_out)) ** 0.5
    # stored as (fan_in, fan_out) so the kernel computes x @ W (== x @ W_pt.T)
    return jax.random.uniform(key, (fan_in, fan_out), jnp.float32, -bound, bound)


def _linear_bias(key, fan_in, fan_out):
    bound = 1.0 / (fan_in ** 0.5)
    return jax.random.uniform(key, (1, fan_out), jnp.float32, -bound, bound)


def make_raw_params(key):
    """Raw (w, b, bn_scale, bn_shift) per layer, eval-mode BN folded to (s, t)."""
    ks = jax.random.split(key, 6)
    eps = 1e-5

    def bn_fold(num_features):
        # PyTorch BatchNorm1d defaults: gamma=1, beta=0, mean=0, var=1
        gamma = jnp.ones((1, num_features), jnp.float32)
        beta = jnp.zeros((1, num_features), jnp.float32)
        mean = jnp.zeros((1, num_features), jnp.float32)
        var = jnp.ones((1, num_features), jnp.float32)
        s = gamma / jnp.sqrt(var + eps)
        t = beta - mean * s
        return s, t

    w1 = _xavier_uniform(ks[0], 12, 128)
    b1 = _linear_bias(ks[1], 12, 128)
    w2 = _xavier_uniform(ks[2], 128, 128)
    b2 = _linear_bias(ks[3], 128, 128)
    w3 = _xavier_uniform(ks[4], 128, 64)
    b3 = _linear_bias(ks[5], 128, 64)
    s1, t1 = bn_fold(128)
    s2, t2 = bn_fold(128)
    s3, t3 = bn_fold(64)
    return (w1, b1, s1, t1, w2, b2, s2, t2, w3, b3, s3, t3)


def fold_params(raw, compute_dtype=jnp.bfloat16):
    """Fold bias + eval-BN into the weights.

    Layer-1 weights stay f32 (exactness is free at K=12); layer-2/3 weights
    are pre-cast to `compute_dtype` ONCE here so the per-call hot path does no
    casting at all.  Shifts stay f32 (epilogue is f32, v5e-safe).
    """
    (w1, b1, s1, t1, w2, b2, s2, t2, w3, b3, s3, t3) = raw

    def fold(w, b, s, t):
        return w * s, b * s + t        # W' (K,N), t' (1,N)

    w1f, t1f = fold(w1, b1, s1, t1)
    w2f, t2f = fold(w2, b2, s2, t2)
    w3f, t3f = fold(w3, b3, s3, t3)

    return (w1f, t1f,
            w2f.astype(compute_dtype), t2f,
            w3f.astype(compute_dtype), t3f)


def reference_forward(x, raw):
    (w1, b1, s1, t1, w2, b2, s2, t2, w3, b3, s3, t3) = raw
    h = jnp.maximum((x @ w1 + b1) * s1 + t1, 0.0)
    h = jnp.maximum((h @ w2 + b2) * s2 + t2, 0.0)
    h = jnp.maximum((h @ w3 + b3) * s3 + t3, 0.0)
    return h


# ----------------------------------- main ------------------------------------

if __name__ == "__main__":
    key = jax.random.PRNGKey(0)
    pkey, xkey = jax.random.split(key)

    raw = make_raw_params(pkey)
    folded_f32 = fold_params(raw, compute_dtype=jnp.float32)
    folded_bf16 = fold_params(raw, compute_dtype=jnp.bfloat16)

    B = 16
    x = jax.random.normal(xkey, (B, 12), jnp.float32)   # batch=16, features=12
    ref = reference_forward(x, raw)

    # exact (f32 compute) path -- tight check against the JAX reference
    out_f32 = jax.block_until_ready(feat_l_kirp_forward(x, folded_f32))
    assert out_f32.shape == (B, 64)
    assert jnp.allclose(out_f32, ref, atol=1e-4, rtol=1e-4)

    # fast (bf16 layer-2/3 matmuls, f32 accumulation) path -- production config
    out_bf16 = jax.block_until_ready(feat_l_kirp_forward(x, folded_bf16))
    assert out_bf16.shape == (B, 64)
    assert bool(jnp.all(jnp.isfinite(out_bf16)))
    assert float(jnp.max(jnp.abs(out_bf16 - ref))) < 1e-1  # bf16 tolerance

    # partial-last-block path (B not a multiple of the sublane tile)
    B2 = 40
    x2 = jax.random.normal(jax.random.PRNGKey(2), (B2, 12), jnp.float32)
    out2 = jax.block_until_ready(feat_l_kirp_forward(x2, folded_f32))
    assert out2.shape == (B2, 64)
    assert jnp.allclose(out2, reference_forward(x2, raw), atol=1e-4, rtol=1e-4)

    print("KERNEL_OK")
</pallas_src>

<mosaic_0001>
module attributes {stable_mosaic.version = 11 : i64} {
  func.func @_mlp_kernel(%arg0: i32, %arg1: memref<16x12xf32, #tpu.memory_space<vmem>>, %arg2: memref<12x128xf32, #tpu.memory_space<vmem>>, %arg3: memref<1x128xf32, #tpu.memory_space<vmem>>, %arg4: memref<128x128xf32, #tpu.memory_space<vmem>>, %arg5: memref<1x128xf32, #tpu.memory_space<vmem>>, %arg6: memref<128x64xf32, #tpu.memory_space<vmem>>, %arg7: memref<1x64xf32, #tpu.memory_space<vmem>>, %arg8: memref<16x64xf32, #tpu.memory_space<vmem>>) attributes {dimension_semantics = [#tpu.dimension_semantics<parallel>], iteration_bounds = array<i64: 1>, scalar_prefetch = 0 : i64, scratch_operands = 0 : i64, tpu.core_type = #tpu.core_type<tc>, window_params = [{transform_indices = @transform_0, window_bounds = array<i64: 16, 12>}, {pipeline_mode = #tpu.pipeline_mode<synchronous>, transform_indices = @transform_1, window_bounds = array<i64: 12, 128>}, {pipeline_mode = #tpu.pipeline_mode<synchronous>, transform_indices = @transform_2, window_bounds = array<i64: 1, 128>}, {pipeline_mode = #tpu.pipeline_mode<synchronous>, transform_indices = @transform_3, window_bounds = array<i64: 128, 128>}, {pipeline_mode = #tpu.pipeline_mode<synchronous>, transform_indices = @transform_4, window_bounds = array<i64: 1, 128>}, {pipeline_mode = #tpu.pipeline_mode<synchronous>, transform_indices = @transform_5, window_bounds = array<i64: 128, 64>}, {pipeline_mode = #tpu.pipeline_mode<synchronous>, transform_indices = @transform_6, window_bounds = array<i64: 1, 64>}, {transform_indices = @transform_7, window_bounds = array<i64: 16, 64>}]} {
    %c0 = arith.constant 0 : index
    %c0_0 = arith.constant 0 : index
    %0 = vector.load %arg1[%c0, %c0_0] : memref<16x12xf32, #tpu.memory_space<vmem>>, vector<16x12xf32>
    %c0_1 = arith.constant 0 : index
    %c0_2 = arith.constant 0 : index
    %1 = vector.load %arg2[%c0_1, %c0_2] : memref<12x128xf32, #tpu.memory_space<vmem>>, vector<12x128xf32>
    %cst = arith.constant dense<0.000000e+00> : vector<16x128xf32>
    %2 = tpu.matmul %0, %1, %cst {dimension_numbers = #tpu.dot_dimension_numbers<[1], [0], [0], [1], [0, 0, 1, 1], [], []>} : vector<16x12xf32>, vector<12x128xf32>, vector<16x128xf32> -> vector<16x128xf32>
    %c0_3 = arith.constant 0 : index
    %c0_4 = arith.constant 0 : index
    %3 = vector.load %arg3[%c0_3, %c0_4] : memref<1x128xf32, #tpu.memory_space<vmem>>, vector<1x128xf32>
    %4 = vector.broadcast %3 : vector<1x128xf32> to vector<16x128xf32>
    %5 = arith.addf %2, %4 : vector<16x128xf32>
    %cst_5 = arith.constant 0.000000e+00 : f32
    %6 = vector.broadcast %cst_5 : f32 to vector<16x128xf32>
    %7 = arith.maximumf %5, %6 : vector<16x128xf32>
    %c0_6 = arith.constant 0 : index
    %c0_7 = arith.constant 0 : index
    %8 = vector.load %arg4[%c0_6, %c0_7] : memref<128x128xf32, #tpu.memory_space<vmem>>, vector<128x128xf32>
    %cst_8 = arith.constant dense<0.000000e+00> : vector<16x128xf32>
    %9 = tpu.matmul %7, %8, %cst_8 {dimension_numbers = #tpu.dot_dimension_numbers<[1], [0], [0], [1], [0, 0, 1, 1], [], []>} : vector<16x128xf32>, vector<128x128xf32>, vector<16x128xf32> -> vector<16x128xf32>
    %c0_9 = arith.constant 0 : index
    %c0_10 = arith.constant 0 : index
    %10 = vector.load %arg5[%c0_9, %c0_10] : memref<1x128xf32, #tpu.memory_space<vmem>>, vector<1x128xf32>
    %11 = vector.broadcast %10 : vector<1x128xf32> to vector<16x128xf32>
    %12 = arith.addf %9, %11 : vector<16x128xf32>
    %cst_11 = arith.constant 0.000000e+00 : f32
    %13 = vector.broadcast %cst_11 : f32 to vector<16x128xf32>
    %14 = arith.maximumf %12, %13 : vector<16x128xf32>
    %c0_12 = arith.constant 0 : index
    %c0_13 = arith.constant 0 : index
    %15 = vector.load %arg6[%c0_12, %c0_13] : memref<128x64xf32, #tpu.memory_space<vmem>>, vector<128x64xf32>
    %cst_14 = arith.constant dense<0.000000e+00> : vector<16x64xf32>
    %16 = tpu.matmul %14, %15, %cst_14 {dimension_numbers = #tpu.dot_dimension_numbers<[1], [0], [0], [1], [0, 0, 1, 1], [], []>} : vector<16x128xf32>, vector<128x64xf32>, vector<16x64xf32> -> vector<16x64xf32>
    %c0_15 = arith.constant 0 : index
    %c0_16 = arith.constant 0 : index
    %17 = vector.load %arg7[%c0_15, %c0_16] : memref<1x64xf32, #tpu.memory_space<vmem>>, vector<1x64xf32>
    %18 = vector.broadcast %17 : vector<1x64xf32> to vector<16x64xf32>
    %19 = arith.addf %16, %18 : vector<16x64xf32>
    %cst_17 = arith.constant 0.000000e+00 : f32
    %20 = vector.broadcast %cst_17 : f32 to vector<16x64xf32>
    %21 = arith.maximumf %19, %20 : vector<16x64xf32>
    %c0_18 = arith.constant 0 : index
    %c0_19 = arith.constant 0 : index
    %22 = vector.load %arg8[%c0_18, %c0_19] : memref<16x64xf32, #tpu.memory_space<vmem>>, vector<16x64xf32>
    tpu.vector_store %arg8[%c0_18, %c0_19], %21 {strides = array<i32>} : memref<16x64xf32, #tpu.memory_space<vmem>>, vector<16x64xf32>,
    return
  }
  func.func @transform_0(%arg0: i32) -> (i32, i32) {
    %c0_i32 = arith.constant 0 : i32
    %c0_i32_0 = arith.constant 0 : i32
    return %arg0, %c0_i32 : i32, i32
  }
  func.func @transform_1(%arg0: i32) -> (i32, i32) {
    %c0_i32 = arith.constant 0 : i32
    %c0_i32_0 = arith.constant 0 : i32
    %c0_i32_1 = arith.constant 0 : i32
    return %c0_i32, %c0_i32_0 : i32, i32
  }
  func.func @transform_2(%arg0: i32) -> (i32, i32) {
    %c0_i32 = arith.constant 0 : i32
    %c0_i32_0 = arith.constant 0 : i32
    %c0_i32_1 = arith.constant 0 : i32
    return %c0_i32, %c0_i32_0 : i32, i32
  }
  func.func @transform_3(%arg0: i32) -> (i32, i32) {
    %c0_i32 = arith.constant 0 : i32
    %c0_i32_0 = arith.constant 0 : i32
    %c0_i32_1 = arith.constant 0 : i32
    return %c0_i32, %c0_i32_0 : i32, i32
  }
  func.func @transform_4(%arg0: i32) -> (i32, i32) {
    %c0_i32 = arith.constant 0 : i32
    %c0_i32_0 = arith.constant 0 : i32
    %c0_i32_1 = arith.constant 0 : i32
    return %c0_i32, %c0_i32_0 : i32, i32
  }
  func.func @transform_5(%arg0: i32) -> (i32, i32) {
    %c0_i32 = arith.constant 0 : i32
    %c0_i32_0 = arith.constant 0 : i32
    %c0_i32_1 = arith.constant 0 : i32
    return %c0_i32, %c0_i32_0 : i32, i32
  }
  func.func @transform_6(%arg0: i32) -> (i32, i32) {
    %c0_i32 = arith.constant 0 : i32
    %c0_i32_0 = arith.constant 0 : i32
    %c0_i32_1 = arith.constant 0 : i32
    return %c0_i32, %c0_i32_0 : i32, i32
  }
  func.func @transform_7(%arg0: i32) -> (i32, i32) {
    %c0_i32 = arith.constant 0 : i32
    %c0_i32_0 = arith.constant 0 : i32
    return %arg0, %c0_i32 : i32, i32
  }
}

</mosaic_0001>

<bundles_post_ra>
// kernel: tpu_custom_call.1
= control target key start
LH: loop header
LB: loop body
LE: loop exit
PB: predicated region body
PF: predicated region fallthrough
CT: control target
= control target key end

     0   :  { %vm42_vm0 = vcmask 1043456   ;;  %vm35_vm1 = vcmask 97280   ;;  %s414_s0 = inlined_call_operand.vmem [shape: f32[16,12], index: 0, kind: input, shape index: {}]   ;;  %s415_s1 = inlined_call_operand.vmem [shape: f32[12,128], index: 1, kind: input, shape index: {}]   ;;  %s416_s2 = inlined_call_operand.vmem [shape: f32[1,128], index: 2, kind: input, shape index: {}]   ;;  %s417_s3 = inlined_call_operand.vmem [shape: f32[128,128], index: 3, kind: input, shape index: {}]   ;;  %s418_s4 = inlined_call_operand.vmem [shape: f32[1,128], index: 4, kind: input, shape index: {}]   ;;  %s419_s5 = inlined_call_operand.vmem [shape: f32[128,64], index: 5, kind: input, shape index: {}]   ;;  %s420_s6 = inlined_call_operand.vmem [shape: f32[1,64], index: 6, kind: input, shape index: {}]   ;;  %s421_s7 = inlined_call_operand.hbm [shape: f32[16,64], index: 7, kind: output, shape index: {}]  }
   0x1   :  { %v30_v0 = vld [vmem:[%s415_s1 + $0x8] sm:$0xf]  ;;  %v29_v1 = vld [vmem:[%s415_s1] sm:$0xff]  ;;  %v86_v3 = vld [vmem:[%s417_s3 + $0x78] sm:$0xff] }
   0x2   :  { %182 = vmatpush.msk.msra.mxu0 %vm42_vm0, %v30_v0  ;;  %v27_v2 = vld [vmem:[%s414_s0] sm:$0xff]  ;;  %v85_v4 = vld [vmem:[%s417_s3 + $0x70] sm:$0xff]  ;;  %91 = vmatpush.msra.mxu1 %v86_v3  ;;  %v84_v5 = vld [vmem:[%s417_s3 + $0x68] sm:$0xff] }
   0x3   :  { %185 = vmatpush.msra.mxu3 %v86_v3  ;;  %v83_v6 = vld [vmem:[%s417_s3 + $0x60] sm:$0xff]  ;;  %v82_v7 = vld [vmem:[%s417_s3 + $0x58] sm:$0xff] }
   0x4   :  { %61 = vmatpush.msra.mxu0 %v29_v1  ;;  %92 = vmatpush.msra.mxu1 %v85_v4 }
   0x5   :  { %183 = vmatmul.msk.f32.vlgmr.msra.gmra.mxu0 %vm35_vm1, %v27_v2  ;;  %186 = vmatpush.msra.mxu3 %v85_v4 }
   0x6   :  { %93 = vmatpush.msra.mxu1 %v84_v5 }
   0x7   :  { %187 = vmatpush.msra.mxu3 %v84_v5 }
   0x8   :  { %12 = vsyncpa [#allocation3], 0  ;;  %94 = vmatpush.msra.mxu1 %v83_v6  ;;  %v28_v8 = vld [vmem:[%s414_s0 + $0x8] sm:$0xff]  ;;  %v81_v9 = vld [vmem:[%s417_s3 + $0x50] sm:$0xff]  ;;  %vm161_vm2 = vcmask 523264   ;;  %s170_s26 = sshll.u32 %s421_s7, 4  ;;  %s171_s26 = int_to_ptr.hbm [resolvable:$true] %s170_s26 }
   0x9   :  { %188 = vmatpush.msra.mxu3 %v83_v6  ;;  %v80_v10 = vld [vmem:[%s417_s3 + $0x48] sm:$0xff]  ;;  %v79_v11 = vld [vmem:[%s417_s3 + $0x40] sm:$0xff]  ;;  %v78_v12 = vld [vmem:[%s417_s3 + $0x38] sm:$0xff]  ;;  %s250_s27 = smov 128   ;;  %s251_s28 = smov 8  }
   0xa   :  { %95 = vmatpush.msra.mxu1 %v82_v7  ;;  %v77_v13 = vld [vmem:[%s417_s3 + $0x30] sm:$0xff]  ;;  %v76_v14 = vld [vmem:[%s417_s3 + $0x28] sm:$0xff]  ;;  %v75_v15 = vld [vmem:[%s417_s3 + $0x20] sm:$0xff] }
   0xb   :  { %189 = vmatpush.msra.mxu3 %v82_v7  ;;  %v74_v16 = vld [vmem:[%s417_s3 + $0x18] sm:$0xff]  ;;  %v73_v17 = vld [vmem:[%s417_s3 + $0x10] sm:$0xff]  ;;  %v72_v18 = vld [vmem:[%s417_s3 + $0x8] sm:$0xff] }
   0xc   :  { %96 = vmatpush.msra.mxu1 %v81_v9  ;;  %v71_v19 = vld [vmem:[%s417_s3] sm:$0xff]  ;;  %v131_v20 = vld [vmem:[%s419_s5 + $0x78] sm:$0xff]  ;;  %v130_v21 = vld [vmem:[%s419_s5 + $0x70] sm:$0xff] }
   0xd   :  { %184 = vmatmul.msk.f32.gmra.mxu0 %vm35_vm1, %v28_v8  ;;  %190 = vmatpush.msra.mxu3 %v81_v9  ;;  %v129_v22 = vld [vmem:[%s419_s5 + $0x68] sm:$0xff]  ;;  %v128_v23 = vld [vmem:[%s419_s5 + $0x60] sm:$0xff]  ;;  %v127_v24 = vld [vmem:[%s419_s5 + $0x58] sm:$0xff] }
   0xe   :  { %97 = vmatpush.msra.mxu1 %v80_v10  ;;  %136 = vmatpush.msrb.mxu0 %v131_v20  ;;  %v126_v25 = vld [vmem:[%s419_s5 + $0x50] sm:$0xff]  ;;  %v125_v26 = vld [vmem:[%s419_s5 + $0x48] sm:$0xff]  ;;  %v124_v27 = vld [vmem:[%s419_s5 + $0x40] sm:$0xff] }
   0xf   :  { %191 = vmatpush.msra.mxu3 %v80_v10  ;;  %201 = vmatpush.msra.mxu2 %v131_v20  ;;  %v123_v28 = vld [vmem:[%s419_s5 + $0x38] sm:$0xff]  ;;  %v220_v29 = vld [vmem:[%s416_s2] ss:$0 sm:$0xff]  ;;  %v122_v30 = vld [vmem:[%s419_s5 + $0x30] sm:$0xff] }
  0x10   :  { %98 = vmatpush.msra.mxu1 %v79_v11  ;;  %137 = vmatpush.msrb.mxu0 %v130_v21  ;;  %v121_v31 = vld [vmem:[%s419_s5 + $0x28] sm:$0xff]  ;;  %v120_v34 = vld [vmem:[%s419_s5 + $0x20] sm:$0xff]  ;;  %v119_v36 = vld [vmem:[%s419_s5 + $0x18] sm:$0xff] }
  0x11   :  { %192 = vmatpush.msra.mxu3 %v79_v11  ;;  %202 = vmatpush.msra.mxu2 %v130_v21  ;;  %v118_v40 = vld [vmem:[%s419_s5 + $0x10] sm:$0xff]  ;;  %v117_v41 = vld [vmem:[%s419_s5 + $0x8] sm:$0xff]  ;;  %v116_v42 = vld [vmem:[%s419_s5] sm:$0xff]  ;;  %s249_s5 = smov [#allocation2]  }
  0x12   :  { %99 = vmatpush.msra.mxu1 %v78_v12  ;;  %138 = vmatpush.msrb.mxu0 %v129_v22  ;;  %v221_v43 = vld [vmem:[%s418_s4] ss:$0 sm:$0xff]  ;;  %s168_s24 = sshll.u32 %s249_s5, 4  ;;  %s169_s24 = int_to_ptr.vmem [resolvable:$true] %s168_s24 }
  0x13   :  { %193 = vmatpush.msra.mxu3 %v78_v12  ;;  %203 = vmatpush.msra.mxu2 %v129_v22  ;;  %v222_v50 = vld [vmem:[%s420_s6] ss:$0 sm:$0xff] }
  0x14   :  { %100 = vmatpush.msra.mxu1 %v77_v13  ;;  %139 = vmatpush.msrb.mxu0 %v128_v23 }
  0x15   :  { %194 = vmatpush.msra.mxu3 %v77_v13  ;;  %204 = vmatpush.msra.mxu2 %v128_v23 }
  0x16   :  { %101 = vmatpush.msra.mxu1 %v76_v14  ;;  %140 = vmatpush.msrb.mxu0 %v127_v24 }
  0x17   :  { %195 = vmatpush.msra.mxu3 %v76_v14  ;;  %205 = vmatpush.msra.mxu2 %v127_v24 }
  0x18   :  { %102 = vmatpush.msra.mxu1 %v75_v15  ;;  %141 = vmatpush.msrb.mxu0 %v126_v25 }
  0x19   :  { %196 = vmatpush.msra.mxu3 %v75_v15  ;;  %206 = vmatpush.msra.mxu2 %v126_v25 }
  0x1a   :  { %103 = vmatpush.msra.mxu1 %v74_v16  ;;  %142 = vmatpush.msrb.mxu0 %v125_v26 }
  0x1b   :  { %197 = vmatpush.msra.mxu3 %v74_v16  ;;  %207 = vmatpush.msra.mxu2 %v125_v26 }
  0x1c   :  { %104 = vmatpush.msra.mxu1 %v73_v17  ;;  %143 = vmatpush.msrb.mxu0 %v124_v27 }
  0x1d   :  { %198 = vmatpush.msra.mxu3 %v73_v17  ;;  %208 = vmatpush.msra.mxu2 %v124_v27 }
  0x1e   :  { %105 = vmatpush.msra.mxu1 %v72_v18  ;;  %144 = vmatpush.msrb.mxu0 %v123_v28 }
  0x1f   :  { %199 = vmatpush.msra.mxu3 %v72_v18  ;;  %209 = vmatpush.msra.mxu2 %v123_v28 }
  0x20   :  { %106 = vmatpush.msra.mxu1 %v71_v19  ;;  %145 = vmatpush.msrb.mxu0 %v122_v30 }
  0x21   :  { %200 = vmatpush.msra.mxu3 %v71_v19  ;;  %210 = vmatpush.msra.mxu2 %v122_v30 }
  0x22   :  { %146 = vmatpush.msrb.mxu0 %v121_v31 }
  0x23   :  { %211 = vmatpush.msra.mxu2 %v121_v31 }
  0x24   :  { %147 = vmatpush.msrb.mxu0 %v120_v34 }
  0x25   :  { %212 = vmatpush.msra.mxu2 %v120_v34 }
  0x26   :  { %148 = vmatpush.msrb.mxu0 %v119_v36 }
  0x27   :  { %213 = vmatpush.msra.mxu2 %v119_v36 }
  0x28   :  { %149 = vmatpush.msrb.mxu0 %v118_v40 }
  0x29   :  { %214 = vmatpush.msra.mxu2 %v118_v40 }
  0x2a   :  { %150 = vmatpush.msrb.mxu0 %v117_v41 }
  0x2b   :  { %215 = vmatpush.msra.mxu2 %v117_v41 }
  0x2c   :  { %151 = vmatpush.msrb.mxu0 %v116_v42 }
  0x2d   :  { %216 = vmatpush.msra.mxu2 %v116_v42 }
  0x82   :  { %v63_v32 = vpop.f32.mrf.mxu0 }
  0x83   :  { %v64_v33 = vadd.f32 %v220_v29, %v63_v32 }
  0x85   :  { %v69_v35 = vmax.f32 %v64_v33, 0.0 }
  0x87   :  { %107 = vmatmul.f32.vlgmr.msra.gmra.mxu1 %v69_v35 }
  0x8a   :  { %v66_v37 = vpop.f32.mrf.mxu0 }
  0x8b   :  { %v67_v38 = vadd.f32 %v220_v29, %v66_v37 }
  0x8d   :  { %v70_v39 = vmax.f32 %v67_v38, 0.0 }
  0x8f   :  { %110 = vmatmul.f32.vlgmr.msra.gmra.mxu3 %v70_v39 }
 0x104   :  { %v108_v44 = vpop.f32.mrf.mxu1 }
 0x105   :  { %v109_v45 = vadd.f32 %v221_v43, %v108_v44 }
 0x107   :  { %v114_v46 = vmax.f32 %v109_v45, 0.0 }
 0x109   :  { %152 = vmatmul.f32.vlgmr.msrb.gmra.mxu0 %v114_v46 }
 0x112   :  { %v111_v47 = vpop.f32.mrf.mxu3 }
 0x113   :  { %v112_v48 = vadd.f32 %v221_v43, %v111_v47 }
 0x115   :  { %v115_v49 = vmax.f32 %v112_v48, 0.0 }
 0x117   :  { %155 = vmatmul.f32.vlgmr.msra.gmra.mxu2 %v115_v49 }
 0x186   :  { %v153_v51 = vpop.f32.mrf.mxu0 }
 0x187   :  { %v154_v52 = vadd.f32 %v222_v50, %v153_v51 }
 0x189   :  { %v159_v53 = vmax.f32 %v154_v52, 0.0 }
 0x18b   :  { %162 = vst.msk [vmem:[#allocation2] sm:$0xff] %vm161_vm2, %v159_v53 }
 0x19a   :  { %v156_v54 = vpop.f32.mrf.mxu2 }
 0x19b   :  { %v157_v55 = vadd.f32 %v222_v50, %v156_v54 }
 0x19d   :  { %v160_v56 = vmax.f32 %v157_v55, 0.0 }
 0x19f   :  { %163 = vst.msk [vmem:[#allocation2 + $0x8] sm:$0xff] %vm161_vm2, %v160_v56 }
 0x1a0   :  { %176 = dma.vmem_to_hbm [thread:$0]  %s169_s24, 256, %s171_s26, [#allocation3], %s250_s27, %s250_s27, %s251_s28  }
 0x1a1   :  { %247 = dma.done.wait [#allocation3], 256  }
 0x1a2   :  { %248 = vsyncadd [#allocation3], 4294967040 }
 0x1a3   :  { %181 = vsyncpa [#allocation3], 1 }

</bundles_post_ra>
